<compile_context>
chip_gen: v7x
topology: tpu7x:2x2x1
jax: 0.10.0
libtpu: 0.0.40
codegen_flags: <defaults>
</compile_context>

<pallas_src>
import functools

import jax
import jax.numpy as jnp
from jax import lax
from jax.experimental import pallas as pl
from jax.experimental.pallas import tpu as pltpu

_LANE = 128
_SUBLANE_F32 = 8
_SUBLANE_BF16 = 16


def _round_up(x, m):
    return (x + m - 1) // m * m


def _gelu(x, approximate):
    if approximate:
        # tanh-GELU lowers to the EUP slot -> co-issues with MXU/VALU work.
        return jax.nn.gelu(x, approximate=True)
    # PyTorch nn.GELU() default: exact erf-based GELU (VALU polynomial).
    return 0.5 * x * (1.0 + lax.erf(x * 0.7071067811865476))


def _embedding_fc_kernel(x_ref, w1_ref, b1_ref, w2_ref, b2_ref, o_ref, *,
                         vpu_first_proj, approximate_gelu):
    x = x_ref[...]                                            # [TM, K]
    if vpu_first_proj:
        # K is tiny: unrolled broadcast-MAC on the VPU.  An MXU matmul here
        # costs ~TM/8 vmatmul issues regardless of K, i.e. as much MXU time
        # as the real (E x E) matmul below while doing K/E of the work.
        xf = x.astype(jnp.float32)
        w1 = w1_ref[...].astype(jnp.float32)
        tm, e = xf.shape[0], w1.shape[1]
        h = jnp.broadcast_to(b1_ref[...].astype(jnp.float32), (tm, e))
        for k in range(xf.shape[1]):                          # static unroll
            h = h + xf[:, k:k + 1] * w1[k:k + 1, :]
    else:
        h = jnp.dot(x, w1_ref[...], preferred_element_type=jnp.float32)
        h = h + b1_ref[...].astype(jnp.float32)
    h = _gelu(h, approximate_gelu)                            # f32 elementwise
    # Second projection on the MXU, f32 accumulation.
    y = jnp.dot(h.astype(w2_ref.dtype), w2_ref[...],
                preferred_element_type=jnp.float32)
    y = y + b2_ref[...].astype(jnp.float32)
    o_ref[...] = y.astype(o_ref.dtype)


def prepare_params(w1, b1, w2, b2, *, compute_dtype=None):
    """One-time parameter prep (hoisted out of the per-call path).

    Weights are stored transposed [in_features, out_features]; biases are
    [1, out_features] and always stay f32 (added after f32 accumulation).
    Set compute_dtype=jnp.bfloat16 on v6e/v7x for ~2x MXU throughput and half
    the weight DMA / VMEM footprint (accumulation/GELU stay f32).
    """
    if compute_dtype is not None:
        w1 = w1.astype(compute_dtype)
        w2 = w2.astype(compute_dtype)
    return w1, b1.astype(jnp.float32), w2, b2.astype(jnp.float32)


def _vmem_limit_bytes(tm, input_dim, emb_dim, x_itemsize, w_itemsize, out_itemsize):
    def tile(rows, cols, itemsize):
        # VMEM footprint of a tile, padded to (8, 128) granules (conservative
        # for packed bf16).
        return _round_up(max(rows, 1), _SUBLANE_F32) * _round_up(cols, _LANE) * itemsize

    x_t = tile(tm, input_dim, x_itemsize)
    o_t = tile(tm, emb_dim, out_itemsize)
    w_t = (tile(input_dim, emb_dim, w_itemsize)
           + tile(emb_dim, emb_dim, w_itemsize)
           + 2 * tile(1, emb_dim, 4))
    # x / out tiles are double-buffered by the pipeline; weights have constant
    # index maps but budget 2x to stay conservative, plus scratch headroom.
    need = 2 * (x_t + o_t) + 2 * w_t + (4 << 20)
    return int(min(max(need, 8 << 20), 64 << 20))


def embedding_fc(x, params, *, block_rows=512, approximate_gelu=False):
    """x: [..., input_dim]; params from prepare_params(); returns [N, emb_dim]
    with N = prod(leading dims) -- mirrors x.view(-1, input_dim) in PyTorch."""
    w1, b1, w2, b2 = params
    input_dim, emb_dim = w1.shape
    out_dtype = x.dtype
    x2d = x.reshape(-1, input_dim)
    if x2d.dtype != w1.dtype:
        x2d = x2d.astype(w1.dtype)        # matmul-operand dtype chosen at prep time
    n = x2d.shape[0]

    # Row tile: multiple of the sublane pack (16 for bf16, 8 for f32).  The
    # partial final tile is handled by Pallas' masked partial blocks -- no
    # wrapper-side jnp.pad of x or slicing of the output.
    sub = _SUBLANE_BF16 if w1.dtype == jnp.bfloat16 else _SUBLANE_F32
    tm = _round_up(min(block_rows, _round_up(n, sub)), sub)
    if n < sub:
        tm = n                            # tiny batch: full-extent row block
    grid = (pl.cdiv(n, tm),)

    vpu_first_proj = input_dim <= 16
    kernel = functools.partial(_embedding_fc_kernel,
                               vpu_first_proj=vpu_first_proj,
                               approximate_gelu=approximate_gelu)

    # NOTE(v7x, large emb_dim): for emb_dim >= ~1.5-2K, additionally tile the
    # w2 / output columns with a second grid axis (tile width a multiple of
    # 256 to fill the 2x256 MXU) and consider pipeline_mode=pl.Buffered(1) on
    # the constant-index weight specs so the resident weight block is not
    # double-buffered inside the 64 MiB VMEM.  Not needed at these sizes.
    out = pl.pallas_call(
        kernel,
        out_shape=jax.ShapeDtypeStruct((n, emb_dim), out_dtype),
        grid_spec=pltpu.PrefetchScalarGridSpec(
            num_scalar_prefetch=0,
            grid=grid,
            in_specs=[
                pl.BlockSpec((tm, input_dim), lambda i: (i, 0)),       # x tile
                pl.BlockSpec((input_dim, emb_dim), lambda i: (0, 0)),  # w1 (resident)
                pl.BlockSpec((1, emb_dim), lambda i: (0, 0)),          # b1
                pl.BlockSpec((emb_dim, emb_dim), lambda i: (0, 0)),    # w2 (resident)
                pl.BlockSpec((1, emb_dim), lambda i: (0, 0)),          # b2
            ],
            out_specs=pl.BlockSpec((tm, emb_dim), lambda i: (i, 0)),
        ),
        compiler_params=pltpu.CompilerParams(
            dimension_semantics=("parallel",),   # independent row tiles -> megacore
            vmem_limit_bytes=_vmem_limit_bytes(
                tm, input_dim, emb_dim,
                jnp.dtype(x2d.dtype).itemsize,
                jnp.dtype(w1.dtype).itemsize,
                jnp.dtype(out_dtype).itemsize),
        ),
    )(x2d, w1, b1, w2, b2)
    return out


def init_params(key, input_dim, emb_dim, dtype=jnp.float32):
    """Deterministic init mimicking nn.Linear default (uniform +-1/sqrt(fan_in)).
    Weights are stored transposed: [in_features, out_features]."""
    k1, k2, k3, k4 = jax.random.split(key, 4)
    bound1 = 1.0 / jnp.sqrt(input_dim)
    bound2 = 1.0 / jnp.sqrt(emb_dim)
    w1 = jax.random.uniform(k1, (input_dim, emb_dim), dtype, -bound1, bound1)
    b1 = jax.random.uniform(k2, (1, emb_dim), dtype, -bound1, bound1)
    w2 = jax.random.uniform(k3, (emb_dim, emb_dim), dtype, -bound2, bound2)
    b2 = jax.random.uniform(k4, (1, emb_dim), dtype, -bound2, bound2)
    return w1, b1, w2, b2


def embedding_fc_ref(x, w1, b1, w2, b2, approximate_gelu=False):
    x2d = x.reshape(-1, w1.shape[0]).astype(jnp.float32)
    h = x2d @ w1 + b1
    if approximate_gelu:
        h = jax.nn.gelu(h, approximate=True)
    else:
        h = 0.5 * h * (1.0 + lax.erf(h / jnp.sqrt(2.0)))
    return h @ w2 + b2


if __name__ == "__main__":
    key = jax.random.PRNGKey(0)
    kx, kx2, kp = jax.random.split(key, 3)

    input_dim = 4
    emb_dim = 32
    batch = 2

    w1, b1, w2, b2 = init_params(kp, input_dim, emb_dim)
    params_f32 = prepare_params(w1, b1, w2, b2)

    # Case 1: tiny batch (matches the PyTorch module's typical usage).
    x = jax.random.normal(kx, (batch, input_dim), dtype=jnp.float32)
    out = jax.block_until_ready(embedding_fc(x, params_f32))
    ref = embedding_fc_ref(x, w1, b1, w2, b2)
    assert out.shape == (batch, emb_dim)
    assert jnp.allclose(out, ref, atol=1e-5, rtol=1e-5)

    # Case 2: leading dims flattened (view(-1, input_dim)); block_rows=24 so
    # the row grid has several steps and a *partial* final tile (64 = 2*24+16),
    # exercising the masked-tail path (no wrapper-side pad/slice of x or out).
    x2 = jax.random.normal(kx2, (4, 16, input_dim), dtype=jnp.float32)
    out2 = jax.block_until_ready(embedding_fc(x2, params_f32, block_rows=24))
    ref2 = embedding_fc_ref(x2, w1, b1, w2, b2)
    assert out2.shape == (64, emb_dim)
    assert jnp.allclose(out2, ref2, atol=1e-5, rtol=1e-5)

    # Case 3: bf16 matmul operands (v6e/v7x fast path), f32 accumulation,
    # output dtype preserved as f32.
    params_bf16 = prepare_params(w1, b1, w2, b2, compute_dtype=jnp.bfloat16)
    out3 = jax.block_until_ready(embedding_fc(x2, params_bf16, block_rows=32))
    assert out3.shape == (64, emb_dim)
    assert out3.dtype == jnp.float32
    assert jnp.allclose(out3, ref2, atol=5e-2, rtol=5e-2)

    # Case 4: tanh-approximate GELU (EUP slot) vs the matching reference.
    out4 = jax.block_until_ready(
        embedding_fc(x2, params_f32, block_rows=24, approximate_gelu=True))
    ref4 = embedding_fc_ref(x2, w1, b1, w2, b2, approximate_gelu=True)
    assert jnp.allclose(out4, ref4, atol=1e-5, rtol=1e-5)

    print("KERNEL_OK")
</pallas_src>

<mosaic_0001>
module attributes {stable_mosaic.version = 11 : i64} {
  func.func @_embedding_fc_kernel(%arg0: i32, %arg1: memref<2x4xf32, #tpu.memory_space<vmem>>, %arg2: memref<4x32xf32, #tpu.memory_space<vmem>>, %arg3: memref<1x32xf32, #tpu.memory_space<vmem>>, %arg4: memref<32x32xf32, #tpu.memory_space<vmem>>, %arg5: memref<1x32xf32, #tpu.memory_space<vmem>>, %arg6: memref<2x32xf32, #tpu.memory_space<vmem>>) attributes {dimension_semantics = [#tpu.dimension_semantics<parallel>], iteration_bounds = array<i64: 1>, scalar_prefetch = 0 : i64, scratch_operands = 0 : i64, tpu.core_type = #tpu.core_type<tc>, window_params = [{transform_indices = @transform_0, window_bounds = array<i64: 2, 4>}, {pipeline_mode = #tpu.pipeline_mode<synchronous>, transform_indices = @transform_1, window_bounds = array<i64: 4, 32>}, {pipeline_mode = #tpu.pipeline_mode<synchronous>, transform_indices = @transform_2, window_bounds = array<i64: 1, 32>}, {pipeline_mode = #tpu.pipeline_mode<synchronous>, transform_indices = @transform_3, window_bounds = array<i64: 32, 32>}, {pipeline_mode = #tpu.pipeline_mode<synchronous>, transform_indices = @transform_4, window_bounds = array<i64: 1, 32>}, {transform_indices = @transform_5, window_bounds = array<i64: 2, 32>}]} {
    %c0 = arith.constant 0 : index
    %c0_0 = arith.constant 0 : index
    %0 = vector.load %arg1[%c0, %c0_0] : memref<2x4xf32, #tpu.memory_space<vmem>>, vector<2x4xf32>
    %c0_1 = arith.constant 0 : index
    %c0_2 = arith.constant 0 : index
    %1 = vector.load %arg2[%c0_1, %c0_2] : memref<4x32xf32, #tpu.memory_space<vmem>>, vector<4x32xf32>
    %c0_3 = arith.constant 0 : index
    %c0_4 = arith.constant 0 : index
    %2 = vector.load %arg3[%c0_3, %c0_4] : memref<1x32xf32, #tpu.memory_space<vmem>>, vector<1x32xf32>
    %3 = vector.shape_cast %2 : vector<1x32xf32> to vector<1x32xf32>
    %4 = vector.broadcast %3 : vector<1x32xf32> to vector<2x32xf32>
    %5 = vector.extract_strided_slice %0 {offsets = [0, 0], sizes = [2, 1], strides = [1, 1]} : vector<2x4xf32> to vector<2x1xf32>
    %6 = vector.extract_strided_slice %1 {offsets = [0, 0], sizes = [1, 32], strides = [1, 1]} : vector<4x32xf32> to vector<1x32xf32>
    %7 = vector.broadcast %5 : vector<2x1xf32> to vector<2x32xf32>
    %8 = vector.broadcast %6 : vector<1x32xf32> to vector<2x32xf32>
    %9 = arith.mulf %7, %8 : vector<2x32xf32>
    %10 = arith.addf %4, %9 : vector<2x32xf32>
    %11 = vector.extract_strided_slice %0 {offsets = [0, 1], sizes = [2, 1], strides = [1, 1]} : vector<2x4xf32> to vector<2x1xf32>
    %12 = vector.extract_strided_slice %1 {offsets = [1, 0], sizes = [1, 32], strides = [1, 1]} : vector<4x32xf32> to vector<1x32xf32>
    %13 = vector.broadcast %11 : vector<2x1xf32> to vector<2x32xf32>
    %14 = vector.broadcast %12 : vector<1x32xf32> to vector<2x32xf32>
    %15 = arith.mulf %13, %14 : vector<2x32xf32>
    %16 = arith.addf %10, %15 : vector<2x32xf32>
    %17 = vector.extract_strided_slice %0 {offsets = [0, 2], sizes = [2, 1], strides = [1, 1]} : vector<2x4xf32> to vector<2x1xf32>
    %18 = vector.extract_strided_slice %1 {offsets = [2, 0], sizes = [1, 32], strides = [1, 1]} : vector<4x32xf32> to vector<1x32xf32>
    %19 = vector.broadcast %17 : vector<2x1xf32> to vector<2x32xf32>
    %20 = vector.broadcast %18 : vector<1x32xf32> to vector<2x32xf32>
    %21 = arith.mulf %19, %20 : vector<2x32xf32>
    %22 = arith.addf %16, %21 : vector<2x32xf32>
    %23 = vector.extract_strided_slice %0 {offsets = [0, 3], sizes = [2, 1], strides = [1, 1]} : vector<2x4xf32> to vector<2x1xf32>
    %24 = vector.extract_strided_slice %1 {offsets = [3, 0], sizes = [1, 32], strides = [1, 1]} : vector<4x32xf32> to vector<1x32xf32>
    %25 = vector.broadcast %23 : vector<2x1xf32> to vector<2x32xf32>
    %26 = vector.broadcast %24 : vector<1x32xf32> to vector<2x32xf32>
    %27 = arith.mulf %25, %26 : vector<2x32xf32>
    %28 = arith.addf %22, %27 : vector<2x32xf32>
    %cst = arith.constant 5.000000e-01 : f32
    %29 = vector.broadcast %cst : f32 to vector<2x32xf32>
    %30 = arith.mulf %29, %28 : vector<2x32xf32>
    %cst_5 = arith.constant 0.707106769 : f32
    %31 = vector.broadcast %cst_5 : f32 to vector<2x32xf32>
    %32 = arith.mulf %28, %31 : vector<2x32xf32>
    %33 = math.erf %32 : vector<2x32xf32>
    %cst_6 = arith.constant 1.000000e+00 : f32
    %34 = vector.broadcast %cst_6 : f32 to vector<2x32xf32>
    %35 = arith.addf %34, %33 : vector<2x32xf32>
    %36 = arith.mulf %30, %35 : vector<2x32xf32>
    %c0_7 = arith.constant 0 : index
    %c0_8 = arith.constant 0 : index
    %37 = vector.load %arg4[%c0_7, %c0_8] : memref<32x32xf32, #tpu.memory_space<vmem>>, vector<32x32xf32>
    %cst_9 = arith.constant dense<0.000000e+00> : vector<2x32xf32>
    %38 = tpu.matmul %36, %37, %cst_9 {dimension_numbers = #tpu.dot_dimension_numbers<[1], [0], [0], [1], [0, 0, 1, 1], [], []>} : vector<2x32xf32>, vector<32x32xf32>, vector<2x32xf32> -> vector<2x32xf32>
    %c0_10 = arith.constant 0 : index
    %c0_11 = arith.constant 0 : index
    %39 = vector.load %arg5[%c0_10, %c0_11] : memref<1x32xf32, #tpu.memory_space<vmem>>, vector<1x32xf32>
    %40 = vector.broadcast %39 : vector<1x32xf32> to vector<2x32xf32>
    %41 = arith.addf %38, %40 : vector<2x32xf32>
    %c0_12 = arith.constant 0 : index
    %c0_13 = arith.constant 0 : index
    %42 = vector.load %arg6[%c0_12, %c0_13] : memref<2x32xf32, #tpu.memory_space<vmem>>, vector<2x32xf32>
    tpu.vector_store %arg6[%c0_12, %c0_13], %41 {strides = array<i32>} : memref<2x32xf32, #tpu.memory_space<vmem>>, vector<2x32xf32>,
    return
  }
  func.func @transform_0(%arg0: i32) -> (i32, i32) {
    %c0_i32 = arith.constant 0 : i32
    %c0_i32_0 = arith.constant 0 : i32
    return %arg0, %c0_i32 : i32, i32
  }
  func.func @transform_1(%arg0: i32) -> (i32, i32) {
    %c0_i32 = arith.constant 0 : i32
    %c0_i32_0 = arith.constant 0 : i32
    %c0_i32_1 = arith.constant 0 : i32
    return %c0_i32, %c0_i32_0 : i32, i32
  }
  func.func @transform_2(%arg0: i32) -> (i32, i32) {
    %c0_i32 = arith.constant 0 : i32
    %c0_i32_0 = arith.constant 0 : i32
    %c0_i32_1 = arith.constant 0 : i32
    return %c0_i32, %c0_i32_0 : i32, i32
  }
  func.func @transform_3(%arg0: i32) -> (i32, i32) {
    %c0_i32 = arith.constant 0 : i32
    %c0_i32_0 = arith.constant 0 : i32
    %c0_i32_1 = arith.constant 0 : i32
    return %c0_i32, %c0_i32_0 : i32, i32
  }
  func.func @transform_4(%arg0: i32) -> (i32, i32) {
    %c0_i32 = arith.constant 0 : i32
    %c0_i32_0 = arith.constant 0 : i32
    %c0_i32_1 = arith.constant 0 : i32
    return %c0_i32, %c0_i32_0 : i32, i32
  }
  func.func @transform_5(%arg0: i32) -> (i32, i32) {
    %c0_i32 = arith.constant 0 : i32
    %c0_i32_0 = arith.constant 0 : i32
    return %arg0, %c0_i32 : i32, i32
  }
}

</mosaic_0001>

<bundles_post_ra>
// kernel: tpu_custom_call.1
= control target key start
LH: loop header
LB: loop body
LE: loop exit
PB: predicated region body
PF: predicated region fallthrough
CT: control target
= control target key end

     0   :  { %10 = vsyncpa [#allocation3], 0  ;;  %s452_s0 = inlined_call_operand.hbm [shape: f32[2,4], index: 0, kind: input, shape index: {}]   ;;  %s453_s1 = inlined_call_operand.hbm [shape: f32[4,32], index: 1, kind: input, shape index: {}]   ;;  %s454_s2 = inlined_call_operand.vmem [shape: f32[1,32], index: 2, kind: input, shape index: {}]   ;;  %s455_s3 = inlined_call_operand.hbm [shape: f32[32,32], index: 3, kind: input, shape index: {}]   ;;  %s456_s4 = inlined_call_operand.vmem [shape: f32[1,32], index: 4, kind: input, shape index: {}]   ;;  %s457_s5 = inlined_call_operand.hbm [shape: f32[2,32], index: 5, kind: output, shape index: {}]  }
   0x1   :  { %11 = vsyncpa [#allocation6], 0 }
   0x2   :  { %12 = vsyncpa [#allocation4], 0  ;;  %s355_s18 = smov [#allocation5]   ;;  %s356_s20 = smov [#allocation2]  }
   0x3   :  { %s29_s19 = sshll.u32 %s355_s18, 4  ;;  %s19_s21 = sshll.u32 %s356_s20, 4  ;;  %s30_s19 = int_to_ptr.vmem [resolvable:$true] %s29_s19  ;;  %s20_s21 = int_to_ptr.vmem [resolvable:$true] %s19_s21 }
   0x4   :  { %s261_s24 = scalar_lea.hbm %s453_s1, 64 }
   0x5   :  { %p262_p0 = scmp.ne.s32.totalorder %s453_s1, %s261_s24  ;;  %p265_p1 = scmp.lt.u32.totalorder %s261_s24, %s453_s1 }
   0x7   :  { %p267_p2 = pnand %p265_p1, %p262_p0 }
   0x9   :  { %270 = shalt.err (!%p267_p2)
}
   0xa   :  { %s271_s29 = scalar_lea.vmem %s30_s19, 64  ;;  %p276_p4 = scmp.lt.s32.totalorder %s30_s19, %s30_s19 }
   0xb   :  { %p272_p3 = scmp.ne.s32.totalorder %s30_s19, %s271_s29  ;;  %p277_p5 = scmp.lt.s32.totalorder %s271_s29, %s271_s29 }
   0xd   :  { %p278_p6 = por %p277_p5, %p276_p4 }
   0xf   :  { %p279_p7 = pnand %p278_p6, %p272_p3 }
  0x11   :  { %282 = shalt.err (!%p279_p7)
}
  0x12   :  { %32 = dma.hbm_to_vmem [thread:$0]  %s453_s1, 64, %s30_s19, [#allocation6]  }
  0x13   :  { %s283_s9 = scalar_lea.hbm %s452_s0, 32 }
  0x14   :  { %p284_p8 = scmp.ne.s32.totalorder %s452_s0, %s283_s9  ;;  %p287_p9 = scmp.lt.u32.totalorder %s283_s9, %s452_s0 }
  0x16   :  { %p289_p10 = pnand %p287_p9, %p284_p8 }
  0x18   :  { %292 = shalt.err (!%p289_p10)
}
  0x19   :  { %s293_s14 = scalar_lea.vmem %s20_s21, 32  ;;  %p298_p12 = scmp.lt.s32.totalorder %s20_s21, %s20_s21 }
  0x1a   :  { %p294_p11 = scmp.ne.s32.totalorder %s20_s21, %s293_s14  ;;  %p299_p13 = scmp.lt.s32.totalorder %s293_s14, %s293_s14 }
  0x1c   :  { %p300_p0 = por %p299_p13, %p298_p12 }
  0x1e   :  { %p301_p1 = pnand %p300_p0, %p294_p11 }
  0x20   :  { %304 = shalt.err (!%p301_p1)
}
  0x21   :  { %22 = dma.hbm_to_vmem [thread:$0]  %s452_s0, 32, %s20_s21, [#allocation3]  }
  0x22   :  { %s357_s16 = smov [#allocation7]   ;;  %s305_s20 = scalar_lea.hbm %s455_s3, 512 }
  0x23   :  { %s40_s17 = sshll.u32 %s357_s16, 4  ;;  %p306_p2 = scmp.ne.s32.totalorder %s455_s3, %s305_s20  ;;  %s41_s17 = int_to_ptr.vmem [resolvable:$true] %s40_s17 }
  0x24   :  { %p309_p3 = scmp.lt.u32.totalorder %s305_s20, %s455_s3 }
  0x26   :  { %p311_p4 = pnand %p309_p3, %p306_p2 }
  0x28   :  { %314 = shalt.err (!%p311_p4)
}
  0x29   :  { %s315_s26 = scalar_lea.vmem %s41_s17, 512  ;;  %p320_p6 = scmp.lt.s32.totalorder %s41_s17, %s41_s17 }
  0x2a   :  { %p316_p5 = scmp.ne.s32.totalorder %s41_s17, %s315_s26  ;;  %p321_p7 = scmp.lt.s32.totalorder %s315_s26, %s315_s26 }
  0x2c   :  { %p322_p8 = por %p321_p7, %p320_p6 }
  0x2e   :  { %p323_p9 = pnand %p322_p8, %p316_p5 }
  0x30   :  { %326 = shalt.err (!%p323_p9)
}
  0x31   :  { %s358_s0 = smov 128   ;;  %s359_s21 = smov 8  }
  0x32   :  { %46 = dma.hbm_to_vmem [thread:$0]  %s455_s3, 512, %s41_s17, [#allocation6], %s358_s0, %s358_s0, %s359_s21  }
  0x33   :  { %349 = dma.done.wait [#allocation3], 32  }
  0x34   :  { %350 = vsyncadd [#allocation3], 4294967264 }
  0x35   :  { %351 = dma.done.wait [#allocation6], 576  }
  0x36   :  { %352 = vsyncadd [#allocation6], 4294966720  ;;  %v360_v0 = vmov 0   ;;  %v361_v1 = vmov 2   ;;  %v58_v2 = vld [vmem:[#allocation2] sm:$0x3]  ;;  %v72_v13 = vlaneseq }
  0x37   :  { %254 = vset.pattern.permute.xlu0 %v360_v0  ;;  %256 = vset.pattern.permute.xlu1 %v361_v1  ;;  %v362_v3 = vmov 1   ;;  %v363_v4 = vmov 3   ;;  %v113_v5 = vld [vmem:[#allocation7] sm:$0xff]  ;;  %v114_v6 = vld [vmem:[#allocation7 + $0x8] sm:$0xff]  ;;  %v364_v8 = vmov 0.0|0.0   ;;  %v115_v9 = vld [vmem:[#allocation7 + $0x10] sm:$0xff] }
  0x38   :  { %69 = vperm.xlu0 %254, %v58_v2   ;;  %89 = vperm.xlu1 %256, %v58_v2   ;;  %v236_v7 = vpack.c.bf16 %v114_v6, %v113_v5  ;;  %v116_v10 = vld [vmem:[#allocation7 + $0x18] sm:$0xff]  ;;  %vm365_vm0 = vmmov 0   ;;  %v366_v12 = vmov 0.0   ;;  %v73_v14 = vshrl.u32 %v72_v13, 7  ;;  %s367_s6 = smov [#allocation8]  }
  0x39   :  { %235 = vmatprep.subr.bf16.mxu0 %v364_v8  ;;  %v239_v11 = vpack.c.bf16 %v116_v10, %v115_v9  ;;  %232 = vmatprep.mubr.msk.f32.mxu0 %vm365_vm0, %v366_v12  ;;  %v59_v16 = vld [vmem:[#allocation5] sm:$0xf]  ;;  %v216_v25 = vld [vmem:[%s454_s2] ss:$0 sm:$0xff]  ;;  %vm124_vm1 = vcmask 261120   ;;  %s206_s7 = sshll.u32 %s367_s6, 4  ;;  %s207_s7 = int_to_ptr.vmem [resolvable:$true] %s206_s7 }
  0x3a   :  { %237 = vmatpush3.bf16.msra.mxu0 %v236_v7  ;;  %v74_v15 = vsub.s32 0, %v73_v14  ;;  %v84_v18 = vsub.s32 1, %v73_v14  ;;  %v94_v20 = vsub.s32 2, %v73_v14  ;;  %v104_v22 = vsub.s32 3, %v73_v14  ;;  %v217_v42 = vld [vmem:[%s456_s4] ss:$0 sm:$0xff]  ;;  %p332_p11 = scmp.lt.s32.totalorder %s207_s7, %s207_s7 }
  0x3b   :  { %238 = vmatprep.subr.bf16.mxu0 %v364_v8  ;;  %vm198_vm2 = vcmask 254976   ;;  %s327_s8 = scalar_lea.vmem %s207_s7, 32 }
  0x3c   :  { %255 = vset.pattern.permute.xlu0 %v362_v3  ;;  %257 = vset.pattern.permute.xlu1 %v363_v4  ;;  %v75_v17 = vrot.slane %v59_v16, %v74_v15  ;;  %v85_v24 = vrot.slane %v59_v16, %v84_v18  ;;  %v95_v26 = vrot.slane %v59_v16, %v94_v20  ;;  %p328_p10 = scmp.ne.s32.totalorder %s207_s7, %s327_s8  ;;  %p333_p12 = scmp.lt.s32.totalorder %s327_s8, %s327_s8 }
  0x3d   :  { %79 = vperm.xlu0 %255, %v58_v2   ;;  %99 = vperm.xlu1 %257, %v58_v2   ;;  %v105_v27 = vrot.slane %v59_v16, %v104_v22 }
  0x3e   :  { %240 = vmatpush3.bf16.msra.mxu0 %v239_v11  ;;  %p334_p13 = por %p333_p12, %p332_p11 }
  0x40   :  { %p335_p0 = pnand %p334_p13, %p328_p10 }
  0x41   :  { %258 = vset.pattern.permute.xlu0 %v363_v4 }
  0xb7   :  { %v70_v19 = vpop.permute.xlu0 %69  ;;  %v90_v21 = vpop.permute.xlu1 %89 }
  0xb8   :  { %v76_v23 = vmul.f32 %v75_v17, %v70_v19  ;;  %v96_v32 = vmul.f32 %v95_v26, %v90_v21 }
  0xba   :  { %v77_v30 = vadd.f32 %v216_v25, %v76_v23 }
  0xbc   :  { %v80_v28 = vpop.permute.xlu0 %79  ;;  %v100_v29 = vpop.permute.xlu1 %99 }
  0xbd   :  { %v86_v31 = vmul.f32 %v85_v24, %v80_v28  ;;  %v106_v34 = vmul.f32 %v105_v27, %v100_v29 }
  0xbf   :  { %v87_v33 = vadd.f32 %v86_v31, %v77_v30 }
  0xc1   :  { %v97_v35 = vadd.f32 %v96_v32, %v87_v33 }
  0xc3   :  { %v107_v36 = vadd.f32 %v106_v34, %v97_v35 }
  0xc5   :  { %v109_v37 = vmul.f32 0.70710677, %v107_v36  ;;  %v108_v39 = vmul.f32 0.5, %v107_v36 }
  0xc7   :  { %259 = verf.f32 %v109_v37 }
  0xd1   :  { %v260_v38 = vpop.eup %259 }
  0xd2   :  { %v111_v40 = vadd.f32 1.0, %v260_v38 }
  0xd4   :  { %v112_v41 = vmul.f32 %v111_v40, %v108_v39 }
  0xd6   :  { %233 = vmatmul.mubr.msk.f32.vlgmr.msra.gmra.mrb[0].mxu0 %vm124_vm1, %v112_v41 }
 0x1a9   :  { %v194_v43 = vpop.f32.mrb[0].mxu0 }
 0x1aa   :  { %v195_v44 = vadd.f32 %v217_v42, %v194_v43  ;;  %v234_v45 = vpop.f32.mrb[1].mxu0 }
 0x1ac   :  { %199 = vst.msk [vmem:[#allocation8] sm:$0x3] %vm198_vm2, %v195_v44 }
 0x1ad   :  { %338 = shalt.err (!%p335_p0)
}
 0x1ae   :  { %s339_s11 = scalar_lea.hbm %s457_s5, 32 }
 0x1af   :  { %p340_p1 = scmp.ne.s32.totalorder %s457_s5, %s339_s11  ;;  %p343_p2 = scmp.lt.u32.totalorder %s339_s11, %s457_s5 }
 0x1b1   :  { %p345_p3 = pnand %p343_p2, %p340_p1 }
 0x1b3   :  { %348 = shalt.err (!%p345_p3)
}
 0x1b4   :  { %209 = dma.vmem_to_hbm [thread:$0]  %s207_s7, 32, %s457_s5, [#allocation4]  }
 0x1b5   :  { %353 = dma.done.wait [#allocation4], 32  }
 0x1b6   :  { %354 = vsyncadd [#allocation4], 4294967264 }
 0x1b7   :  { %213 = vsyncpa [#allocation3], 1 }
 0x1b8   :  { %214 = vsyncpa [#allocation6], 1 }
 0x1b9   :  { %215 = vsyncpa [#allocation4], 1 }

</bundles_post_ra>
